<compile_context>
chip_gen: v6e
topology: v6e:2x2x1
jax: 0.10.0
libtpu: 0.0.40
codegen_flags: <defaults>
</compile_context>

<pallas_src>
import functools
import math

import jax
import jax.numpy as jnp
from jax.experimental import pallas as pl
from jax.experimental.pallas import tpu as pltpu


def _round_up(n, m):
    return ((n + m - 1) // m) * m


def _vmem_capacity_bytes():
    try:
        return int(pltpu.get_tpu_info().vmem_capacity_bytes)
    except Exception:
        return 64 * 1024 * 1024   # conservative fallback (v7x per-core VMEM)


# ---------------------------------------------------------------------------
# Path 1: fused single-pass kernel — pool + channel conv + scale per batch elt.
# ---------------------------------------------------------------------------
def _eca_fused_kernel(w_ref, x_ref, o_ref, ypad_ref, *, k_size, pad, cp, inv_hw):
    # w_ref:    (k,) f32 conv taps in SMEM
    # x_ref:    (Cp, HWp) one batch element, native dtype (batch dim squeezed)
    # o_ref:    (Cp, HWp)
    # ypad_ref: (Cp + 2*pad, 1) f32 VMEM scratch for the zero-padded pooled vec
    x = x_ref[...]
    # Global average pool: zero spatial padding adds nothing to the sum; divide
    # by the TRUE H*W.  Accumulate in f32 without upcasting the whole block.
    y = jnp.sum(x, axis=-1, keepdims=True, dtype=jnp.float32) * inv_hw   # (Cp,1)
    # Stage the pooled vector with `pad` explicit zeros on each side — this is
    # exactly Conv1d's zero padding along the channel axis.
    ypad_ref[...] = jnp.zeros_like(ypad_ref)
    ypad_ref[pad:pad + cp, :] = y
    # k-tap conv on the VPU: scale[c] = sum_j w[j] * y[c + j - pad].
    scale = w_ref[0] * ypad_ref[0:cp, :]
    for j in range(1, k_size):
        scale = scale + w_ref[j] * ypad_ref[j:j + cp, :]
    # Broadcast multiply in the input dtype (no f32 copy of the feature map).
    o_ref[...] = x * scale.astype(o_ref.dtype)


def _eca_fused(x3p, w, *, k_size, hw_true, vmem_limit):
    B, Cp, HWp = x3p.shape
    pad = (k_size - 1) // 2
    kernel = functools.partial(
        _eca_fused_kernel, k_size=k_size, pad=pad, cp=Cp,
        inv_hw=float(1.0 / hw_true))
    return pl.pallas_call(
        kernel,
        out_shape=jax.ShapeDtypeStruct((B, Cp, HWp), x3p.dtype),
        grid_spec=pltpu.PrefetchScalarGridSpec(
            num_scalar_prefetch=0,
            grid=(B,),
            in_specs=[
                pl.BlockSpec(memory_space=pltpu.MemorySpace.SMEM),    # conv taps
                pl.BlockSpec((None, Cp, HWp), lambda b: (b, 0, 0)),   # x[b]
            ],
            out_specs=pl.BlockSpec((None, Cp, HWp), lambda b: (b, 0, 0)),
            scratch_shapes=[pltpu.VMEM((Cp + 2 * pad, 1), jnp.float32)],
        ),
        compiler_params=pltpu.CompilerParams(
            # Grid is only (B,); large problems (where dual-TC bandwidth on
            # v7x actually matters) take the two-pass path whose grid also
            # tiles HW in parallel.
            dimension_semantics=("parallel",),
            vmem_limit_bytes=vmem_limit,
        ),
    )(w, x3p)


# ---------------------------------------------------------------------------
# Path 2 (VMEM fallback): lane-dense HW-tiled broadcast-scaling kernel.
# The pool + k-tap conv run in plain XLA on the tiny (B, C) pooled tensor.
# ---------------------------------------------------------------------------
def _eca_scale_kernel(scale_ref, x_ref, o_ref):
    # scale_ref: (Cp, 1) f32 ; x_ref / o_ref: (Cp, T) native dtype
    o_ref[...] = x_ref[...] * scale_ref[...].astype(o_ref.dtype)


def _eca_two_pass_scale(x3p, scale_p, *, tile_hw, vmem_limit):
    B, Cp, HWp = x3p.shape
    return pl.pallas_call(
        _eca_scale_kernel,
        out_shape=jax.ShapeDtypeStruct((B, Cp, HWp), x3p.dtype),
        grid_spec=pltpu.PrefetchScalarGridSpec(
            num_scalar_prefetch=0,
            grid=(B, HWp // tile_hw),
            in_specs=[
                pl.BlockSpec((None, Cp, 1), lambda b, t: (b, 0, 0)),
                pl.BlockSpec((None, Cp, tile_hw), lambda b, t: (b, 0, t)),
            ],
            out_specs=pl.BlockSpec((None, Cp, tile_hw), lambda b, t: (b, 0, t)),
        ),
        compiler_params=pltpu.CompilerParams(
            dimension_semantics=("parallel", "parallel"),
            vmem_limit_bytes=vmem_limit,
        ),
    )(scale_p, x3p)


# ---------------------------------------------------------------------------
# Public wrapper
# ---------------------------------------------------------------------------
def eca_layer(x, conv_weight, k_size, *, force_two_pass=False):
    """x: (B, C, H, W). conv_weight: (k_size,) Conv1d(1,1,k,bias=False) taps."""
    B, C, H, W = x.shape
    HW = H * W
    pad = (k_size - 1) // 2
    itemsize = jnp.dtype(x.dtype).itemsize
    w = conv_weight.astype(jnp.float32)

    Cp = _round_up(C, 8)            # sublane multiple
    HWp = _round_up(HW, 128)        # lane multiple -> unmasked vst on the output

    # ---- VMEM-aware path dispatch ----------------------------------------
    vmem_cap = _vmem_capacity_bytes()
    block_bytes = Cp * HWp * itemsize
    # in + out blocks, double-buffered, plus headroom for in-kernel temporaries.
    fused_need = 6 * block_bytes + (1 << 20)
    use_fused = (fused_need <= int(0.75 * vmem_cap)) and not force_two_pass

    if use_fused:
        tile_hw = HWp
    else:
        tile_hw = min(HWp, 1024)            # lane-dense tiles, >= 8 vregs wide
        HWp = _round_up(HWp, tile_hw)       # make the HW grid axis exact

    x3 = x.reshape(B, C, HW)
    if Cp != C or HWp != HW:
        x3p = jnp.pad(x3, ((0, 0), (0, Cp - C), (0, HWp - HW)))
    else:
        x3p = x3

    if use_fused:
        vmem_limit = min(int(0.9 * vmem_cap), max(fused_need, 32 << 20))
        out3 = _eca_fused(x3p, w, k_size=k_size, hw_true=HW,
                          vmem_limit=vmem_limit)
    else:
        # Pass A (plain XLA): pool over the true H*W, then the k-tap channel
        # conv with zero padding on the tiny (B, C) pooled tensor.
        y = jnp.mean(x3, axis=-1, dtype=jnp.float32)             # (B, C)
        y_pad = jnp.pad(y, ((0, 0), (pad, pad)))
        scale = jnp.zeros((B, C), jnp.float32)
        for j in range(k_size):
            scale = scale + w[j] * y_pad[:, j:j + C]
        scale_p = jnp.pad(scale, ((0, 0), (0, Cp - C)))[:, :, None]  # (B,Cp,1)
        # Pass B (Pallas): HW-tiled broadcast scaling, fully parallel grid.
        scale_need = 4 * Cp * tile_hw * itemsize + 8 * Cp + (1 << 20)
        vmem_limit = min(int(0.9 * vmem_cap), max(scale_need, 32 << 20))
        out3 = _eca_two_pass_scale(x3p, scale_p, tile_hw=tile_hw,
                                   vmem_limit=vmem_limit)

    return out3[:, :C, :HW].reshape(B, C, H, W)


# ---------------------------------------------------------------------------
# Pure-JAX reference matching the PyTorch forward exactly.
# ---------------------------------------------------------------------------
def _reference(x, conv_weight, k_size):
    B, C, H, W = x.shape
    pad = (k_size - 1) // 2
    y = jnp.mean(x.astype(jnp.float32), axis=(2, 3))             # (B, C)
    y_pad = jnp.pad(y, ((0, 0), (pad, pad)))
    conv = jnp.zeros((B, C), jnp.float32)
    for j in range(k_size):
        conv = conv + conv_weight[j] * y_pad[:, j:j + C]
    return (x.astype(jnp.float32) * conv[:, :, None, None]).astype(x.dtype)


if __name__ == "__main__":
    # channels=8 -> k_size = int(abs(log2(8)+1)/2) = 2 -> even -> 3.
    B, C, H, W = 2, 8, 16, 16

    b_const, gamma = 1, 2
    k_size = int(abs(math.log(C, 2) + b_const) / gamma)
    k_size = k_size if k_size % 2 else k_size + 1

    key = jax.random.PRNGKey(0)
    kx, kw = jax.random.split(key)
    x = jax.random.normal(kx, (B, C, H, W), dtype=jnp.float32)
    bound = 1.0 / math.sqrt(k_size)   # PyTorch-like Conv1d default init range
    conv_weight = jax.random.uniform(
        kw, (k_size,), dtype=jnp.float32, minval=-bound, maxval=bound)

    ref = _reference(x, conv_weight, k_size)

    out = eca_layer(x, conv_weight, k_size)                      # fused path
    jax.block_until_ready(out)
    assert jnp.allclose(out, ref, atol=1e-5, rtol=1e-5), "fused path mismatch"

    out2 = eca_layer(x, conv_weight, k_size, force_two_pass=True)  # fallback path
    jax.block_until_ready(out2)
    assert jnp.allclose(out2, ref, atol=1e-5, rtol=1e-5), "two-pass path mismatch"

    print("KERNEL_OK")
</pallas_src>

<mosaic_0001>
module attributes {stable_mosaic.version = 11 : i64} {
  func.func @_eca_fused_kernel(%arg0: i32, %arg1: memref<3xf32, #tpu.memory_space<smem>>, %arg2: memref<1x8x256xf32, #tpu.memory_space<vmem>>, %arg3: memref<1x8x256xf32, #tpu.memory_space<vmem>>, %arg4: memref<10x1xf32, #tpu.memory_space<vmem>>) attributes {dimension_semantics = [#tpu.dimension_semantics<parallel>], iteration_bounds = array<i64: 2>, scalar_prefetch = 0 : i64, scratch_operands = 1 : i64, tpu.core_type = #tpu.core_type<tc>, window_params = [{transform_indices = @transform_0, window_bounds = array<i64: 3>}, {transform_indices = @transform_1, window_bounds = array<i64: 1, 8, 256>}, {transform_indices = @transform_2, window_bounds = array<i64: 1, 8, 256>}]} {
    %c0 = arith.constant 0 : index
    %c0_0 = arith.constant 0 : index
    %c0_1 = arith.constant 0 : index
    %0 = vector.load %arg2[%c0, %c0_0, %c0_1] : memref<1x8x256xf32, #tpu.memory_space<vmem>>, vector<1x8x256xf32>
    %1 = vector.shape_cast %0 : vector<1x8x256xf32> to vector<8x256xf32>
    %cst = arith.constant dense<0.000000e+00> : vector<8xf32>
    %2 = vector.multi_reduction <add>, %1, %cst [1] : vector<8x256xf32> to vector<8xf32>
    %3 = vector.shape_cast %2 : vector<8xf32> to vector<8x1xf32>
    %cst_2 = arith.constant 3.906250e-03 : f32
    %4 = vector.broadcast %cst_2 : f32 to vector<8x1xf32>
    %5 = arith.mulf %3, %4 : vector<8x1xf32>
    %cst_3 = arith.constant 0.000000e+00 : f32
    %6 = vector.broadcast %cst_3 : f32 to vector<10x1xf32>
    %c0_4 = arith.constant 0 : index
    %c0_5 = arith.constant 0 : index
    %7 = vector.load %arg4[%c0_4, %c0_5] : memref<10x1xf32, #tpu.memory_space<vmem>>, vector<10x1xf32>
    tpu.vector_store %arg4[%c0_4, %c0_5], %6 {strides = array<i32>} : memref<10x1xf32, #tpu.memory_space<vmem>>, vector<10x1xf32>,
    %c1 = arith.constant 1 : index
    %c0_6 = arith.constant 0 : index
    %8 = vector.load %arg4[%c1, %c0_6] : memref<10x1xf32, #tpu.memory_space<vmem>>, vector<8x1xf32>
    tpu.vector_store %arg4[%c1, %c0_6], %5 {strides = array<i32>} : memref<10x1xf32, #tpu.memory_space<vmem>>, vector<8x1xf32>,
    %c0_7 = arith.constant 0 : index
    %9 = memref.load %arg1[%c0_7] : memref<3xf32, #tpu.memory_space<smem>>
    %c0_8 = arith.constant 0 : index
    %c0_9 = arith.constant 0 : index
    %10 = vector.load %arg4[%c0_8, %c0_9] : memref<10x1xf32, #tpu.memory_space<vmem>>, vector<8x1xf32>
    %11 = vector.broadcast %9 : f32 to vector<8x1xf32>
    %12 = arith.mulf %11, %10 : vector<8x1xf32>
    %c1_10 = arith.constant 1 : index
    %13 = memref.load %arg1[%c1_10] : memref<3xf32, #tpu.memory_space<smem>>
    %c1_11 = arith.constant 1 : index
    %c0_12 = arith.constant 0 : index
    %14 = vector.load %arg4[%c1_11, %c0_12] : memref<10x1xf32, #tpu.memory_space<vmem>>, vector<8x1xf32>
    %15 = vector.broadcast %13 : f32 to vector<8x1xf32>
    %16 = arith.mulf %15, %14 : vector<8x1xf32>
    %17 = arith.addf %12, %16 : vector<8x1xf32>
    %c2 = arith.constant 2 : index
    %18 = memref.load %arg1[%c2] : memref<3xf32, #tpu.memory_space<smem>>
    %c2_13 = arith.constant 2 : index
    %c0_14 = arith.constant 0 : index
    %19 = vector.load %arg4[%c2_13, %c0_14] : memref<10x1xf32, #tpu.memory_space<vmem>>, vector<8x1xf32>
    %20 = vector.broadcast %18 : f32 to vector<8x1xf32>
    %21 = arith.mulf %20, %19 : vector<8x1xf32>
    %22 = arith.addf %17, %21 : vector<8x1xf32>
    %23 = vector.broadcast %22 : vector<8x1xf32> to vector<8x256xf32>
    %24 = arith.mulf %1, %23 : vector<8x256xf32>
    %c0_15 = arith.constant 0 : index
    %c0_16 = arith.constant 0 : index
    %c0_17 = arith.constant 0 : index
    %25 = vector.load %arg3[%c0_15, %c0_16, %c0_17] : memref<1x8x256xf32, #tpu.memory_space<vmem>>, vector<1x8x256xf32>
    %26 = vector.shape_cast %25 : vector<1x8x256xf32> to vector<8x256xf32>
    %27 = vector.shape_cast %24 : vector<8x256xf32> to vector<1x8x256xf32>
    tpu.vector_store %arg3[%c0_15, %c0_16, %c0_17], %27 {strides = array<i32>} : memref<1x8x256xf32, #tpu.memory_space<vmem>>, vector<1x8x256xf32>,
    return
  }
  func.func @transform_0(%arg0: i32) -> i32 {
    %c0_i32 = arith.constant 0 : i32
    %c0_i32_0 = arith.constant 0 : i32
    return %c0_i32 : i32
  }
  func.func @transform_1(%arg0: i32) -> (i32, i32, i32) {
    %c0_i32 = arith.constant 0 : i32
    %c0_i32_0 = arith.constant 0 : i32
    %c0_i32_1 = arith.constant 0 : i32
    return %arg0, %c0_i32, %c0_i32_0 : i32, i32, i32
  }
  func.func @transform_2(%arg0: i32) -> (i32, i32, i32) {
    %c0_i32 = arith.constant 0 : i32
    %c0_i32_0 = arith.constant 0 : i32
    %c0_i32_1 = arith.constant 0 : i32
    return %arg0, %c0_i32, %c0_i32_0 : i32, i32, i32
  }
}

</mosaic_0001>

<bundles_post_ra>
// kernel: tpu_custom_call.1
= control target key start
LH: loop header
LB: loop body
LE: loop exit
PB: predicated region body
PF: predicated region fallthrough
CT: control target
= control target key end

     0   :  { %7 = vsyncpa [#allocation6], 0  ;;  %s668_s0 = inlined_call_operand.hbm [shape: f32[3], index: 0, kind: input, shape index: {}]   ;;  %s669_s1 = inlined_call_operand.hbm [shape: f32[2,8,256], index: 1, kind: input, shape index: {}]   ;;  %s670_s2 = inlined_call_operand.hbm [shape: f32[2,8,256], index: 2, kind: output, shape index: {}]  }
   0x1   :  { %8 = vsyncpa [#allocation4], 0 }
   0x2   :  { %10 = vsyncpa [#allocation4 + $0x1], 0 }
   0x3   :  { %11 = vsyncpa [#allocation5], 0 }
   0x4   :  { %13 = vsyncpa [#allocation5 + $0x1], 0  ;;  %s512_s9 = smov 0   ;;  %s514_s10 = smov 0  }
   0x5   :  { %s516_s11 = smov 0   ;;  %s518_s12 = smov 0  }
   0x6 LB: > { %s533_s13 = sadd.s32 4294967295, %s490_s12   ;;  %s303_s14 = sadd.s32 4294967294, %s490_s12   ;;  %s490_s12 = sphi %s518_s12, %s690_s12   ;;  %s486_s11 = sphi %s516_s11, %s689_s11   ;;  %s482_s10 = sphi %s514_s10, %s688_s10   ;;  %s478_s9 = sphi %s512_s9, %s687_s9  }
   0x7   : > { %p60_p0 = scmp.ne.s32.totalorder %s482_s10, %s478_s9  ;;  %p671_p1 = scmp.eq.s32.totalorder %s533_s13, 0 }
   0x8   : > { %p84_p2 = scmp.eq.s32.totalorder %s533_s13, 1  ;;  %p90_p3 = scmp.eq.s32.totalorder %s303_s14, 1 }
   0x9   : > { %p542_p4 = por %p671_p1, %p60_p0  ;;  %p304_p5 = scmp.ge.s32.totalorder %s490_s12, 1 }
   0xa   : > { %p547_p6 = por %p90_p3, %p60_p0  ;;  %p97_p7 = scmp.lt.s32.totalorder %s490_s12, 3 }
   0xb   : > { %s675_s15 = scalar_select %p542_p4, 1, 0 }
   0xc   : > { %s676_s16 = scalar_select %p547_p6, 1, 0 }
   0xd   : > { %p552_p8 = pnand %p304_p5, %p97_p7  ;;  %s558_s18 = sadd.s32 1, %s490_s12  }
   0xe   : > { %s44_s19 = ssub.s32 %s490_s12, %s558_s18  ;;  %s47_s20 = sadd.s32 1, %s486_s11 }
   0xf   : > { %s677_s17 = scalar_select %p552_p8, 1, 0 }
  0x10   : > { %p331_p10 = pneg %p552_p8  ;;  %p45_p12 = scmp.eq.s32.totalorder %s44_s19, 0 }
  0x11   : > { %p54_p13 = scmp.ne.s32.totalorder %s486_s11, %s482_s10  ;;  %p55_p0 = scmp.eq.s32.totalorder %s490_s12, 0 }
  0x12   : > { %p332_p11 = pnand %p331_p10, %p671_p1  ;;  %p344_p3 = scmp.lt.s32.totalorder %s490_s12, 2 }
  0x13   : > { %s492_s21 = smov [#allocation3]   ;;  %p56_p5 = por %p55_p0, %p54_p13 }
  0x14   : > { %334 = dma.hbm_to_smem (!%p332_p11), %s668_s0, 16, %s492_s21, [#allocation6]  }
  0x15   : > { %s575_s24 = scalar_select %p45_p12, %s486_s11, %s47_s20  }
  0x16   : > { %p579_p7 = por %p84_p2, %p54_p13  ;;  %s119_s26 = sand.u32 1, %s486_s11  }
  0x17   : > { %s321_s27 = sshll.u32 %s490_s12, 8  ;;  %s307_s28 = sshll.u32 %s119_s26, 4 }
  0x18   : > { %s678_s25 = scalar_select %p579_p7, 1, 0 }
  0x19   : > { %s588_s3 = scalar_lea.hbm %s669_s1, %s321_s27  ;;  %s123_s4 = scalar_lea.vmem [#allocation7], %s307_s28 }
  0x1a   : > { %s131_s5 = sshll.u32 %s123_s4, 4  ;;  %p590_p10 = pnand %p344_p3, %p56_p5  ;;  %s132_s5 = int_to_ptr.vmem [resolvable:$true] %s131_s5 }
  0x1b   : > { %s120_s7 = scalar_lea.sflag [#allocation4], %s119_s26  ;;  %s394_s8 = scalar_lea.hbm %s588_s3, 256 }
  0x1c   : > { %p395_p2 = scmp.ne.s32.totalorder %s588_s3, %s394_s8  ;;  %p396_p11 = pneg %p590_p10 }
  0x1d   : > { %s399_s20 = scalar_lea.hbm %s669_s1, 512  ;;  %p400_p0 = scmp.lt.s32.totalorder %s588_s3, %s669_s1 }
  0x1e   : > { %p397_p12 = pnand %p396_p11, %p395_p2  ;;  %p401_p3 = scmp.lt.s32.totalorder %s399_s20, %s394_s8 }
  0x20   : > { %p398_p13 = pneg %p397_p12  ;;  %p402_p5 = por %p401_p3, %p400_p0 }
  0x22   : > { %p403_p9 = pnand %p402_p5, %p398_p13 }
  0x24   : > { %406 = shalt.err (!%p403_p9)
}
  0x25   : > { %s407_s23 = scalar_lea.vmem %s132_s5, 256  ;;  %s493_s26 = smov [#allocation7]  }
  0x26   : > { %p408_p1 = scmp.ne.s32.totalorder %s132_s5, %s407_s23  ;;  %s412_s27 = sshll.u32 %s493_s26, 4  ;;  %s413_s27 = int_to_ptr.vmem [resolvable:$false] %s412_s27 }
  0x27   : > { %s414_s28 = scalar_lea.vmem %s413_s27, 512  ;;  %p415_p2 = scmp.lt.s32.totalorder %s132_s5, %s413_s27 }
  0x28   : > { %p410_p6 = pnand %p408_p1, %p396_p11  ;;  %p416_p12 = scmp.lt.s32.totalorder %s414_s28, %s407_s23 }
  0x2a   : > { %p411_p7 = pneg %p410_p6  ;;  %p417_p4 = por %p416_p12, %p415_p2 }
  0x2c   : > { %p418_p8 = pnand %p417_p4, %p411_p7 }
  0x2e   : > { %421 = shalt.err (!%p418_p8)
}
  0x2f   : > { %338 = dma.hbm_to_vmem [thread:$0]  (!%p590_p10), %s588_s3, 256, %s132_s5, %s120_s7  }
  0x30   : > { %p680_p13 = scmp.ne.s32.totalorder %s677_s17, 0 }
  0x31   : > { %p681_p9 = scmp.eq.s32.totalorder (!%p680_p13), %s533_s13, 0 }
  0x32   : > { %140 = sbr.rel (%p680_p13) target bundleno = 359 (0x167), region = 28 }
  0x37   : > { %465 = dma.done.wait (%p681_p9), [#allocation6], 16   ;;  %p682_p1 = pmov %p681_p9 }
  0x38   : > { %s615_s29 = sand.u32 1, %s482_s10   ;;  %p683_p4 = scmp.ne.s32.totalorder %s675_s15, 0 }
  0x39   : > { %467 = vsyncadd (%p682_p1), [#allocation6], 4294967280  ;;  %s312_s30 = sshll.u32 %s615_s29, 4  ;;  %s147_s4 = scalar_lea.sflag [#allocation4], %s615_s29 }
  0x3a   : > { %s150_s3 = scalar_lea.vmem [#allocation7], %s312_s30 }
  0x3b   : > { %469 = dma.done.wait (%p683_p4), %s147_s4, 256  }
  0x3c   : > { %471 = vsyncadd (%p683_p4), %s147_s4, 4294967040 }
  0x3d   : > { %155 = sfence }
  0x3e   : > { %v172_v0 = vld [vmem:[%s150_s3] sm:$0xff]  ;;  %v173_v1 = vld [vmem:[%s150_s3 + $0x8] sm:$0xff]  ;;  %vm178_vm0 = vcmask 7168   ;;  %vm180_vm1 = vcmask 1024   ;;  %v494_v3 = vmov 0.0   ;;  %v495_v4 = vmov 0  }
  0x3f   : > { %v174_v2 = vadd.f32 %v173_v1, %v172_v0  ;;  %179 = vst.msk [vmem:[#allocation2] sm:$0xff] %vm178_vm0, %v494_v3  ;;  %382 = vset.pattern.permute.xlu0 %v495_v4  ;;  %s183_s17 = sld [smem:[#allocation3]]  ;;  %s322_s6 = sshll.u32 %s533_s13, 8 }
  0x40   : > { %181 = vst.msk [vmem:[#allocation2 + $0x8] sm:$0x3] %vm180_vm1, %v494_v3  ;;  %s314_s5 = sld [smem:[#allocation3 + $0x1]]  ;;  %s171_s7 = scalar_lea.vmem [#allocation8], %s312_s30 }
  0x41   : > { %175 = vadd.xlane.f32.xlu0 %v174_v2  ;;  %s315_s15 = sld [smem:[#allocation3 + $0x2]]  ;;  %s221_s8 = sshll.u32 %s171_s7, 4  ;;  %s222_s8 = int_to_ptr.vmem [resolvable:$true] %s221_s8 }
  0x42   : > { %s631_s20 = scalar_lea.hbm %s670_s2, %s322_s6  ;;  %s207_s21 = scalar_lea.sflag [#allocation5], %s615_s29 }
  0x43   : > { %s422_s22 = scalar_lea.vmem %s222_s8, 256  ;;  %p684_p8 = scmp.ne.s32.totalorder %s678_s25, 0 }
  0x44   : > { %p423_p6 = scmp.ne.s32.totalorder %s222_s8, %s422_s22  ;;  %s496_s13 = smov [#allocation8]  }
  0x45   : > { %v185_v7 = vstv %s183_s17  ;;  %s426_s23 = sshll.u32 %s496_s13, 4  ;;  %s427_s23 = int_to_ptr.vmem [resolvable:$false] %s426_s23 }
  0x46   : > { %v189_v8 = vstv %s314_s5  ;;  %p424_p7 = pnand %p423_p6, %p684_p8  ;;  %s428_s26 = scalar_lea.vmem %s427_s23, 512 }
  0x47   : > { %v194_v12 = vstv %s315_s15  ;;  %p429_p11 = scmp.lt.s32.totalorder %s222_s8, %s427_s23  ;;  %p430_p0 = scmp.lt.s32.totalorder %s428_s26, %s422_s22 }
  0x48   : > { %p425_p10 = pneg %p424_p7 }
  0x49   : > { %p431_p3 = por %p430_p0, %p429_p11 }
  0x4b   : > { %p432_p5 = pnand %p431_p3, %p425_p10 }
  0xca   : > { %v176_v5 = vpop.xlane.xlu0 %175 }
  0xcb   : > { %v177_v6 = vmul.f32 0.00390625, %v176_v5 }
  0xcd   : > { %182 = vst.msk [vmem:[#allocation2 + $0x1] sm:$0xff] %vm178_vm0, %v177_v6 }
  0xd4   : > { %v184_v9 = vld [vmem:[#allocation2] sm:$0xff] }
  0xd5   : > { %v188_v10 = vld [vmem:[#allocation2 + $0x1] sm:$0xff]  ;;  %v186_v13 = vmul.f32 %v185_v7, %v184_v9 }
  0xd6   : > { %v193_v11 = vld [vmem:[#allocation2 + $0x2] sm:$0xff]  ;;  %v190_v14 = vmul.f32 %v189_v8, %v188_v10 }
  0xd7   : > { %v195_v16 = vmul.f32 %v194_v12, %v193_v11 }
  0xd8   : > { %v191_v15 = vadd.f32 %v190_v14, %v186_v13 }
  0xda   : > { %v196_v17 = vadd.f32 %v195_v16, %v191_v15 }
  0xdc   : > { %199 = vperm.xlu0 %382, %v196_v17  }
 0x157   : > { %v200_v18 = vpop.permute.xlu0 %199 }
 0x158   : > { %v202_v19 = vmul.f32 %v200_v18, %v172_v0  ;;  %v203_v20 = vmul.f32 %v200_v18, %v173_v1 }
 0x15a   : > { %204 = vst [vmem:[%s171_s7] sm:$0xff] %v202_v19  ;;  %205 = vst [vmem:[%s171_s7 + $0x8] sm:$0xff] %v203_v20 }
 0x15b   : > { %435 = shalt.err (!%p432_p5)
}
 0x15c   : > { %s436_s27 = scalar_lea.hbm %s631_s20, 256  ;;  %s440_s30 = scalar_lea.hbm %s670_s2, 512 }
 0x15d   : > { %p437_p2 = scmp.ne.s32.totalorder %s631_s20, %s436_s27  ;;  %p441_p9 = scmp.lt.s32.totalorder %s631_s20, %s670_s2 }
 0x15e   : > { %p442_p1 = scmp.lt.s32.totalorder %s440_s30, %s436_s27 }
 0x15f   : > { %p438_p12 = pnand %p437_p2, %p684_p8 }
 0x160   : > { %p443_p4 = por %p442_p1, %p441_p9 }
 0x161   : > { %p439_p13 = pneg %p438_p12 }
 0x163   : > { %p444_p6 = pnand %p443_p4, %p439_p13 }
 0x165   : > { %447 = shalt.err (!%p444_p6)
}
 0x166   : > { %329 = dma.vmem_to_hbm [thread:$0]  (%p684_p8), %s222_s8, 256, %s631_s20, %s207_s21  }
 0x167 PF: > { %s233_s17 = sand.u32 1, %s478_s9   ;;  %p685_p7 = scmp.ne.s32.totalorder %s676_s16, 0 }
 0x168   : > { %p686_p10 = scmp.ge.s32.totalorder %s490_s12, 2  ;;  %s234_s5 = scalar_lea.sflag [#allocation5], %s233_s17 }
 0x16a   : > { %p340_p11 = pnand %p686_p10, %p685_p7 }
 0x16c   : > { %p341_p0 = pneg %p340_p11 }
 0x16e   : > { %473 = dma.done.wait (%p341_p0), %s234_s5, 256  }
 0x16f   : > { %475 = vsyncadd (%p341_p0), %s234_s5, 4294967040  ;;  %p16_p3 = scmp.ge.s32.totalorder %s558_s18, 4   ;;  %s687_s9 = smov %s482_s10 }
 0x170   : > { %s688_s10 = smov %s486_s11  ;;  %s689_s11 = smov %s575_s24 }
 0x171   : > { %s690_s12 = smov %s558_s18  ;;  %18 = sbr.rel (!%p16_p3) target bundleno = 6 (0x6), region = 78 }
 0x176   :  { %239 = vsyncpa [#allocation4], 1 }
 0x177   :  { %241 = vsyncpa [#allocation4 + $0x1], 1 }
 0x178   :  { %242 = vsyncpa [#allocation5], 1 }
 0x179   :  { %244 = vsyncpa [#allocation5 + $0x1], 1 }
 0x17a   :  { %245 = vsyncpa [#allocation6], 1 }
 0x17b   :  { %247 = vsyncpa [#allocation6 + $0x1], 1 }

</bundles_post_ra>
